<compile_context>
chip_gen: v7x
topology: tpu7x:2x2x1
jax: 0.10.0
libtpu: 0.0.40
codegen_flags: <defaults>
</compile_context>

<pallas_src>
import functools

import numpy as np
import jax
import jax.numpy as jnp
from jax import lax
from jax.experimental import pallas as pl
from jax.experimental.pallas import tpu as pltpu


def _round_up(x, m):
    return ((x + m - 1) // m) * m


def _barycenter_kernel(g_ref, w_ref, k_ref, out_ref, *, n_iter, eps):
    # g_ref : (MAXD, NB, D)  neighbor-major gathered distributions for NB nodes
    # w_ref : (NB, MAXD)     barycenter weights (uniform 1/degree, 0 = padding)
    # k_ref : (D, D)         Gibbs kernel K = exp(-C/reg)
    # out_ref:(NB, D)        Wasserstein barycenter per node
    A3 = g_ref[...].astype(jnp.float32)
    MAXD, NB, D = A3.shape
    # Single tile-aligned flatten (second-minor dims NB / MAXD*NB are
    # multiples of 8); every loop-iteration value stays 2-D.
    A = A3.reshape(MAXD * NB, D)

    K = k_ref[...].astype(jnp.float32)
    W = w_ref[...].astype(jnp.float32)
    # Hoist the per-neighbor weight broadcasts out of the hot loop.
    w_b = [jnp.broadcast_to(W[:, m:m + 1], (NB, D)) for m in range(MAXD)]

    def half_step(u):
        # v_k = a_k / (K^T u_k)      (row-major: u @ K)
        Ku = jnp.dot(u, K, preferred_element_type=jnp.float32)
        v = A * pl.reciprocal(Ku + eps, approx=True)
        # K v_k                      (row-major: v @ K^T, contract K's columns)
        Kv = lax.dot_general(v, K, (((1,), (1,)), ((), ())),
                             preferred_element_type=jnp.float32)
        return Kv

    def log_geomean(Kv):
        # Weighted geometric mean over the neighbor axis, as a sum of MAXD
        # aligned (NB, D) slices of the 2-D slab (no reshape).
        log_Kv = jnp.log(Kv + eps)
        log_p = w_b[0] * log_Kv[0:NB]
        for m in range(1, MAXD):
            log_p = log_p + w_b[m] * log_Kv[m * NB:(m + 1) * NB]
        return log_p

    def body(_, u):
        Kv = half_step(u)
        p = jnp.exp(log_geomean(Kv))                      # (NB, D)
        pb = jnp.concatenate([p] * MAXD, axis=0)          # tile-aligned repeat
        u_new = pb * pl.reciprocal(Kv + eps, approx=True)
        return u_new

    u0 = jnp.ones((MAXD * NB, D), jnp.float32)
    u = lax.fori_loop(0, n_iter - 1, body, u0)
    # Final half-iteration: produce p (equivalent to n_iter full iterations of
    # the coupled (u, p) recursion, without carrying p through the loop).
    Kv = half_step(u)
    p = jnp.exp(log_geomean(Kv))
    out_ref[...] = p.astype(out_ref.dtype)


def barycenter_update_pallas(G, W, K, *, n_iter=30, node_block=256, eps=1e-30):
    """One Barycenter_update: per-node Sinkhorn barycenter of gathered dists.

    G: (max_deg, n_pad, d) neighbor-major gathered distributions.
    W: (n_pad, max_deg)    barycenter weights.
    K: (d, d)              Gibbs kernel.
    """
    max_deg, n_pad, d = G.shape
    assert node_block % 8 == 0 and n_pad % node_block == 0
    kernel = functools.partial(_barycenter_kernel, n_iter=n_iter, eps=eps)
    return pl.pallas_call(
        kernel,
        out_shape=jax.ShapeDtypeStruct((n_pad, d), jnp.float32),
        grid_spec=pltpu.PrefetchScalarGridSpec(
            num_scalar_prefetch=0,
            grid=(n_pad // node_block,),
            in_specs=[
                pl.BlockSpec((max_deg, node_block, d), lambda i: (0, i, 0)),
                pl.BlockSpec((node_block, max_deg), lambda i: (i, 0)),
                pl.BlockSpec((d, d), lambda i: (0, 0)),
            ],
            out_specs=pl.BlockSpec((node_block, d), lambda i: (i, 0)),
        ),
        compiler_params=pltpu.CompilerParams(
            dimension_semantics=("parallel",)),
    )(G, W, K)


def wgcn_layer_forward(trans_X, costMatrix, adj_list, degree, h,
                       *, reg=0.05, n_iter=30, node_block=256):
    """Equivalent of WGCN_layer.forward with bary_weight='uniform'."""
    n, d = trans_X.shape
    max_deg = max(len(a) + 1 for a in adj_list)

    # Node-block sizing: as large as possible (<= node_block), multiple of 8,
    # and pad the node count so the grid tiles evenly.
    nb = max(8, _round_up(min(node_block, _round_up(n, 8)), 8))
    n_pad = _round_up(n, nb)

    # Build padded neighbor indices and uniform barycenter weights (host glue).
    idx = np.zeros((n_pad, max_deg), dtype=np.int32)
    wts = np.zeros((n_pad, max_deg), dtype=np.float32)
    for j in range(n):
        neighs = list(adj_list[j]) + [j]          # neighbors + self (as in ref)
        for t, k in enumerate(neighs):
            idx[j, t] = k
            wts[j, t] = 1.0 / float(degree[j])    # 'uniform' branch
        for t in range(len(neighs), max_deg):     # padding: self, zero weight
            idx[j, t] = j
            wts[j, t] = 0.0
    for j in range(n, n_pad):                     # padded dummy nodes
        idx[j, :] = 0
        wts[j, 0] = 1.0
    idxT = jnp.asarray(idx.T)                     # (max_deg, n_pad) neighbor-major
    wts = jnp.asarray(wts)                        # (n_pad, max_deg)

    K = jnp.exp(-costMatrix.astype(jnp.float32) / reg)

    # TODO(synk): the reference calls an external `barycenter.compute` that is
    # not provided; the Sinkhorn/IBP barycenter above is used in its place.
    # TODO(synk): the neighbor gather stays as XLA jnp.take; fusing it into the
    # kernel (scalar-prefetch idx + manual row DMAs from HBM) is a further
    # HBM-traffic optimization for large graphs.
    X = trans_X.astype(jnp.float32)
    for _ in range(h):
        G = jnp.take(X, idxT, axis=0)             # (max_deg, n_pad, d) gather
        Xp = barycenter_update_pallas(G, wts, K, n_iter=n_iter, node_block=nb)
        X = Xp[:n]
    return X


if __name__ == "__main__":
    n_nodes = 16     # graph size
    n_bins = 128     # histogram support size (lane-aligned)
    h = 2            # number of WGCN layers

    # Ring graph: each node has 2 neighbors; degree includes self -> 3.
    adj_list = [[(j - 1) % n_nodes, (j + 1) % n_nodes] for j in range(n_nodes)]
    degree = [len(a) + 1 for a in adj_list]

    key = jax.random.PRNGKey(0)
    k1, _ = jax.random.split(key)
    logits = jax.random.normal(k1, (n_nodes, n_bins), dtype=jnp.float32)
    trans_X = jax.nn.softmax(logits, axis=-1)     # rows are prob. histograms

    # Squared-distance cost on a 1-D grid of bins.
    pos = jnp.arange(n_bins, dtype=jnp.float32) / n_bins
    costMatrix = (pos[:, None] - pos[None, :]) ** 2

    out = wgcn_layer_forward(trans_X, costMatrix, adj_list, degree, h,
                             reg=0.05, n_iter=30)
    out = jax.block_until_ready(out)

    assert out.shape == (n_nodes, n_bins)
    assert bool(jnp.all(jnp.isfinite(out)))
    print("KERNEL_OK")
</pallas_src>

<mosaic_0001>
module attributes {stable_mosaic.version = 11 : i64} {
  func.func @_barycenter_kernel(%arg0: i32, %arg1: memref<3x16x128xf32, #tpu.memory_space<vmem>>, %arg2: memref<16x3xf32, #tpu.memory_space<vmem>>, %arg3: memref<128x128xf32, #tpu.memory_space<vmem>>, %arg4: memref<16x128xf32, #tpu.memory_space<vmem>>) attributes {dimension_semantics = [#tpu.dimension_semantics<parallel>], iteration_bounds = array<i64: 1>, scalar_prefetch = 0 : i64, scratch_operands = 0 : i64, tpu.core_type = #tpu.core_type<tc>, window_params = [{transform_indices = @transform_0, window_bounds = array<i64: 3, 16, 128>}, {transform_indices = @transform_1, window_bounds = array<i64: 16, 3>}, {pipeline_mode = #tpu.pipeline_mode<synchronous>, transform_indices = @transform_2, window_bounds = array<i64: 128, 128>}, {transform_indices = @transform_3, window_bounds = array<i64: 16, 128>}]} {
    %c0 = arith.constant 0 : index
    %c0_0 = arith.constant 0 : index
    %c0_1 = arith.constant 0 : index
    %0 = vector.load %arg1[%c0, %c0_0, %c0_1] : memref<3x16x128xf32, #tpu.memory_space<vmem>>, vector<3x16x128xf32>
    %1 = vector.shape_cast %0 : vector<3x16x128xf32> to vector<48x128xf32>
    %c0_2 = arith.constant 0 : index
    %c0_3 = arith.constant 0 : index
    %2 = vector.load %arg3[%c0_2, %c0_3] : memref<128x128xf32, #tpu.memory_space<vmem>>, vector<128x128xf32>
    %c0_4 = arith.constant 0 : index
    %c0_5 = arith.constant 0 : index
    %3 = vector.load %arg2[%c0_4, %c0_5] : memref<16x3xf32, #tpu.memory_space<vmem>>, vector<16x3xf32>
    %4 = vector.extract_strided_slice %3 {offsets = [0, 0], sizes = [16, 1], strides = [1, 1]} : vector<16x3xf32> to vector<16x1xf32>
    %5 = vector.shape_cast %4 : vector<16x1xf32> to vector<16x1xf32>
    %6 = vector.broadcast %5 : vector<16x1xf32> to vector<16x128xf32>
    %7 = vector.extract_strided_slice %3 {offsets = [0, 1], sizes = [16, 1], strides = [1, 1]} : vector<16x3xf32> to vector<16x1xf32>
    %8 = vector.shape_cast %7 : vector<16x1xf32> to vector<16x1xf32>
    %9 = vector.broadcast %8 : vector<16x1xf32> to vector<16x128xf32>
    %10 = vector.extract_strided_slice %3 {offsets = [0, 2], sizes = [16, 1], strides = [1, 1]} : vector<16x3xf32> to vector<16x1xf32>
    %11 = vector.shape_cast %10 : vector<16x1xf32> to vector<16x1xf32>
    %12 = vector.broadcast %11 : vector<16x1xf32> to vector<16x128xf32>
    %cst = arith.constant 1.000000e+00 : f32
    %13 = vector.broadcast %cst : f32 to vector<48x128xf32>
    %c0_i32 = arith.constant 0 : i32
    %c29_i32 = arith.constant 29 : i32
    %14 = arith.addi %c0_i32, %c29_i32 : i32
    %c1_i32 = arith.constant 1 : i32
    %15 = scf.for %arg5 = %c0_i32 to %14 step %c1_i32 iter_args(%arg6 = %13) -> (vector<48x128xf32>)  : i32 {
      %cst_12 = arith.constant dense<0.000000e+00> : vector<48x128xf32>
      %35 = tpu.matmul %arg6, %2, %cst_12 {dimension_numbers = #tpu.dot_dimension_numbers<[1], [0], [0], [1], [0, 0, 1, 1], [], []>} : vector<48x128xf32>, vector<128x128xf32>, vector<48x128xf32> -> vector<48x128xf32>
      %cst_13 = arith.constant 1.000000e-30 : f32
      %36 = vector.broadcast %cst_13 : f32 to vector<48x128xf32>
      %37 = arith.addf %35, %36 : vector<48x128xf32>
      %38 = tpu.reciprocal %37 {approx = true} : vector<48x128xf32> -> vector<48x128xf32>
      %39 = arith.mulf %1, %38 : vector<48x128xf32>
      %cst_14 = arith.constant dense<0.000000e+00> : vector<48x128xf32>
      %40 = tpu.matmul %39, %2, %cst_14 {dimension_numbers = #tpu.dot_dimension_numbers<[1], [1], [0], [0], [0, 0, 1, 0], [], []>} : vector<48x128xf32>, vector<128x128xf32>, vector<48x128xf32> -> vector<48x128xf32>
      %cst_15 = arith.constant 1.000000e-30 : f32
      %41 = vector.broadcast %cst_15 : f32 to vector<48x128xf32>
      %42 = arith.addf %40, %41 : vector<48x128xf32>
      %43 = math.log %42 : vector<48x128xf32>
      %44 = vector.extract_strided_slice %43 {offsets = [0, 0], sizes = [16, 128], strides = [1, 1]} : vector<48x128xf32> to vector<16x128xf32>
      %45 = arith.mulf %6, %44 : vector<16x128xf32>
      %46 = vector.extract_strided_slice %43 {offsets = [16, 0], sizes = [16, 128], strides = [1, 1]} : vector<48x128xf32> to vector<16x128xf32>
      %47 = arith.mulf %9, %46 : vector<16x128xf32>
      %48 = arith.addf %45, %47 : vector<16x128xf32>
      %49 = vector.extract_strided_slice %43 {offsets = [32, 0], sizes = [16, 128], strides = [1, 1]} : vector<48x128xf32> to vector<16x128xf32>
      %50 = arith.mulf %12, %49 : vector<16x128xf32>
      %51 = arith.addf %48, %50 : vector<16x128xf32>
      %52 = math.exp %51 : vector<16x128xf32>
      %53 = tpu.concatenate %52, %52, %52 in 0 : vector<16x128xf32>, vector<16x128xf32>, vector<16x128xf32> -> vector<48x128xf32>
      %cst_16 = arith.constant 1.000000e-30 : f32
      %54 = vector.broadcast %cst_16 : f32 to vector<48x128xf32>
      %55 = arith.addf %40, %54 : vector<48x128xf32>
      %56 = tpu.reciprocal %55 {approx = true} : vector<48x128xf32> -> vector<48x128xf32>
      %57 = arith.mulf %53, %56 : vector<48x128xf32>
      scf.yield %57 : vector<48x128xf32>
    }
    %cst_6 = arith.constant dense<0.000000e+00> : vector<48x128xf32>
    %16 = tpu.matmul %15, %2, %cst_6 {dimension_numbers = #tpu.dot_dimension_numbers<[1], [0], [0], [1], [0, 0, 1, 1], [], []>} : vector<48x128xf32>, vector<128x128xf32>, vector<48x128xf32> -> vector<48x128xf32>
    %cst_7 = arith.constant 1.000000e-30 : f32
    %17 = vector.broadcast %cst_7 : f32 to vector<48x128xf32>
    %18 = arith.addf %16, %17 : vector<48x128xf32>
    %19 = tpu.reciprocal %18 {approx = true} : vector<48x128xf32> -> vector<48x128xf32>
    %20 = arith.mulf %1, %19 : vector<48x128xf32>
    %cst_8 = arith.constant dense<0.000000e+00> : vector<48x128xf32>
    %21 = tpu.matmul %20, %2, %cst_8 {dimension_numbers = #tpu.dot_dimension_numbers<[1], [1], [0], [0], [0, 0, 1, 0], [], []>} : vector<48x128xf32>, vector<128x128xf32>, vector<48x128xf32> -> vector<48x128xf32>
    %cst_9 = arith.constant 1.000000e-30 : f32
    %22 = vector.broadcast %cst_9 : f32 to vector<48x128xf32>
    %23 = arith.addf %21, %22 : vector<48x128xf32>
    %24 = math.log %23 : vector<48x128xf32>
    %25 = vector.extract_strided_slice %24 {offsets = [0, 0], sizes = [16, 128], strides = [1, 1]} : vector<48x128xf32> to vector<16x128xf32>
    %26 = arith.mulf %6, %25 : vector<16x128xf32>
    %27 = vector.extract_strided_slice %24 {offsets = [16, 0], sizes = [16, 128], strides = [1, 1]} : vector<48x128xf32> to vector<16x128xf32>
    %28 = arith.mulf %9, %27 : vector<16x128xf32>
    %29 = arith.addf %26, %28 : vector<16x128xf32>
    %30 = vector.extract_strided_slice %24 {offsets = [32, 0], sizes = [16, 128], strides = [1, 1]} : vector<48x128xf32> to vector<16x128xf32>
    %31 = arith.mulf %12, %30 : vector<16x128xf32>
    %32 = arith.addf %29, %31 : vector<16x128xf32>
    %33 = math.exp %32 : vector<16x128xf32>
    %c0_10 = arith.constant 0 : index
    %c0_11 = arith.constant 0 : index
    %34 = vector.load %arg4[%c0_10, %c0_11] : memref<16x128xf32, #tpu.memory_space<vmem>>, vector<16x128xf32>
    tpu.vector_store %arg4[%c0_10, %c0_11], %33 {strides = array<i32>} : memref<16x128xf32, #tpu.memory_space<vmem>>, vector<16x128xf32>,
    return
  }
  func.func @transform_0(%arg0: i32) -> (i32, i32, i32) {
    %c0_i32 = arith.constant 0 : i32
    %c0_i32_0 = arith.constant 0 : i32
    %c0_i32_1 = arith.constant 0 : i32
    return %c0_i32, %arg0, %c0_i32_0 : i32, i32, i32
  }
  func.func @transform_1(%arg0: i32) -> (i32, i32) {
    %c0_i32 = arith.constant 0 : i32
    %c0_i32_0 = arith.constant 0 : i32
    return %arg0, %c0_i32 : i32, i32
  }
  func.func @transform_2(%arg0: i32) -> (i32, i32) {
    %c0_i32 = arith.constant 0 : i32
    %c0_i32_0 = arith.constant 0 : i32
    %c0_i32_1 = arith.constant 0 : i32
    return %c0_i32, %c0_i32_0 : i32, i32
  }
  func.func @transform_3(%arg0: i32) -> (i32, i32) {
    %c0_i32 = arith.constant 0 : i32
    %c0_i32_0 = arith.constant 0 : i32
    return %arg0, %c0_i32 : i32, i32
  }
}

</mosaic_0001>

<bundles_post_ra>
// kernel: tpu_custom_call.1
= control target key start
LH: loop header
LB: loop body
LE: loop exit
PB: predicated region body
PF: predicated region fallthrough
CT: control target
= control target key end

     0   :  { %8 = vsyncpa [#allocation3], 0  ;;  %s1553_s0 = inlined_call_operand.hbm [shape: f32[3,16,128], index: 0, kind: input, shape index: {}]   ;;  %s1554_s1 = inlined_call_operand.vmem [shape: f32[16,3], index: 1, kind: input, shape index: {}]   ;;  %s1555_s2 = inlined_call_operand.hbm [shape: f32[128,128], index: 2, kind: input, shape index: {}]   ;;  %s1556_s3 = inlined_call_operand.hbm [shape: f32[16,128], index: 3, kind: output, shape index: {}]  }
   0x1   :  { %9 = vsyncpa [#allocation6], 0 }
   0x2   :  { %10 = vsyncpa [#allocation4], 0  ;;  %s1260_s12 = smov [#allocation2]   ;;  %s1132_s16 = scalar_lea.hbm %s1553_s0, 768 }
   0x3   :  { %s16_s13 = sshll.u32 %s1260_s12, 4  ;;  %p1133_p0 = scmp.ne.s32.totalorder %s1553_s0, %s1132_s16  ;;  %s17_s13 = int_to_ptr.vmem [resolvable:$true] %s16_s13 }
   0x4   :  { %p1136_p1 = scmp.lt.u32.totalorder %s1132_s16, %s1553_s0 }
   0x6   :  { %p1138_p2 = pnand %p1136_p1, %p1133_p0 }
   0x8   :  { %1141 = shalt.err (!%p1138_p2)
}
   0x9   :  { %s1142_s21 = scalar_lea.vmem %s17_s13, 768  ;;  %p1147_p4 = scmp.lt.s32.totalorder %s17_s13, %s17_s13 }
   0xa   :  { %p1143_p3 = scmp.ne.s32.totalorder %s17_s13, %s1142_s21  ;;  %p1148_p5 = scmp.lt.s32.totalorder %s1142_s21, %s1142_s21 }
   0xc   :  { %p1149_p6 = por %p1148_p5, %p1147_p4 }
   0xe   :  { %p1150_p7 = pnand %p1149_p6, %p1143_p3 }
  0x10   :  { %1153 = shalt.err (!%p1150_p7)
}
  0x11   :  { %s1261_s22 = smov 128   ;;  %s1262_s23 = smov 8  }
  0x12   :  { %22 = dma.hbm_to_vmem [thread:$0]  %s1553_s0, 768, %s17_s13, [#allocation3], %s1261_s22, %s1261_s22, %s1262_s23  }
  0x13   :  { %s1263_s26 = smov [#allocation5]   ;;  %s1154_s30 = scalar_lea.hbm %s1555_s2, 2048 }
  0x14   :  { %s30_s27 = sshll.u32 %s1263_s26, 4  ;;  %p1155_p8 = scmp.ne.s32.totalorder %s1555_s2, %s1154_s30  ;;  %s31_s27 = int_to_ptr.vmem [resolvable:$true] %s30_s27 }
  0x15   :  { %p1158_p9 = scmp.lt.u32.totalorder %s1154_s30, %s1555_s2 }
  0x17   :  { %p1160_p10 = pnand %p1158_p9, %p1155_p8 }
  0x19   :  { %1163 = shalt.err (!%p1160_p10)
}
  0x1a   :  { %s1164_s8 = scalar_lea.vmem %s31_s27, 2048  ;;  %p1169_p12 = scmp.lt.s32.totalorder %s31_s27, %s31_s27 }
  0x1b   :  { %p1165_p11 = scmp.ne.s32.totalorder %s31_s27, %s1164_s8  ;;  %p1170_p13 = scmp.lt.s32.totalorder %s1164_s8, %s1164_s8 }
  0x1d   :  { %p1171_p0 = por %p1170_p13, %p1169_p12 }
  0x1f   :  { %p1172_p1 = pnand %p1171_p0, %p1165_p11 }
  0x21   :  { %1175 = shalt.err (!%p1172_p1)
}
  0x22   :  { %36 = dma.hbm_to_vmem [thread:$0]  %s1555_s2, 2048, %s31_s27, [#allocation6], %s1261_s22, %s1261_s22, %s1262_s23  }
  0x23   :  { %1226 = dma.done.wait [#allocation3], 768  }
  0x24   :  { %1227 = vsyncadd [#allocation3], 4294966528 }
  0x25   :  { %1228 = dma.done.wait [#allocation6], 2048  }
  0x26   :  { %1229 = vsyncadd [#allocation6], 4294965248  ;;  %v1264_v0 = vmov 1   ;;  %v1265_v1 = vmov 0   ;;  %v1318_v2 = vld [vmem:[#allocation2] sm:$0xff]  ;;  %v1320_v3 = vld [vmem:[#allocation2 + $0x8] sm:$0xff] }
  0x27   :  { %1061 = vset.pattern.permute.xlu1 %v1264_v0  ;;  %1060 = vset.pattern.permute.xlu0 %v1265_v1  ;;  %v1322_v4 = vld [vmem:[#allocation2 + $0x10] sm:$0xff]  ;;  %v1324_v5 = vld [vmem:[#allocation2 + $0x18] sm:$0xff]  ;;  %v1326_v6 = vld [vmem:[#allocation2 + $0x20] sm:$0xff]  ;;  %v1266_v26 = vmov 2   ;;  %v1380_v33 = vmov 1.0   ;;  %v1382_v34 = vmov 1.0  }
  0x28   :  { %v1328_v7 = vld [vmem:[#allocation2 + $0x28] sm:$0xff]  ;;  %v1330_v8 = vld [vmem:[#allocation5] sm:$0xff]  ;;  %v1332_v9 = vld [vmem:[#allocation5 + $0x8] sm:$0xff]  ;;  %v1384_v35 = vmov 1.0   ;;  %v1386_v36 = vmov 1.0   ;;  %v1388_v37 = vmov 1.0  }
  0x29   :  { %v1334_v10 = vld [vmem:[#allocation5 + $0x10] sm:$0xff]  ;;  %v1336_v11 = vld [vmem:[#allocation5 + $0x18] sm:$0xff]  ;;  %v1338_v12 = vld [vmem:[#allocation5 + $0x20] sm:$0xff]  ;;  %v1390_v38 = vmov 1.0  }
  0x2a   :  { %v1340_v13 = vld [vmem:[#allocation5 + $0x28] sm:$0xff]  ;;  %v1342_v14 = vld [vmem:[#allocation5 + $0x30] sm:$0xff]  ;;  %v1344_v15 = vld [vmem:[#allocation5 + $0x38] sm:$0xff] }
  0x2b   :  { %v1346_v16 = vld [vmem:[#allocation5 + $0x40] sm:$0xff]  ;;  %v1348_v17 = vld [vmem:[#allocation5 + $0x48] sm:$0xff]  ;;  %v1350_v18 = vld [vmem:[#allocation5 + $0x50] sm:$0xff] }
  0x2c   :  { %v1352_v19 = vld [vmem:[#allocation5 + $0x58] sm:$0xff]  ;;  %v1354_v20 = vld [vmem:[#allocation5 + $0x60] sm:$0xff]  ;;  %v1356_v21 = vld [vmem:[#allocation5 + $0x68] sm:$0xff] }
  0x2d   :  { %v1358_v22 = vld [vmem:[#allocation5 + $0x70] sm:$0xff]  ;;  %v1360_v23 = vld [vmem:[#allocation5 + $0x78] sm:$0xff] }
  0x2e   :  { %v65_v24 = vld [vmem:[%s1554_s1] sm:$0xff]  ;;  %v66_v25 = vld [vmem:[%s1554_s1 + $0x8] sm:$0xff]  ;;  %s1392_s1 = smov 0  }
  0x2f   :  { %78 = vperm.xlu1 %1061, %v65_v24   ;;  %69 = vperm.xlu0 %1060, %v65_v24  }
  0x33   :  { %82 = vperm.xlu1 %1061, %v66_v25   ;;  %74 = vperm.xlu0 %1060, %v66_v25  }
  0x37   :  { %1063 = vset.pattern.permute.xlu1 %v1266_v26  ;;  %1062 = vset.pattern.permute.xlu0 %v1266_v26 }
  0x38   :  { %90 = vperm.xlu1 %1063, %v66_v25   ;;  %86 = vperm.xlu0 %1062, %v65_v24  }
  0xae   :  { %v1368_v27 = vpop.permute.xlu1 %78  ;;  %v1370_v28 = vpop.permute.xlu0 %69 }
  0xb2   :  { %v1372_v29 = vpop.permute.xlu1 %82  ;;  %v1374_v30 = vpop.permute.xlu0 %74 }
  0xb7   :  { %v1376_v31 = vpop.permute.xlu1 %90  ;;  %v1378_v32 = vpop.permute.xlu0 %86 }
  0xb8 LB: > { %v1405_v39 = vpack.c.bf16 %v1332_v9, %v1330_v8  ;;  %v1409_v40 = vpack.c.bf16 %v1336_v11, %v1334_v10  ;;  %v1418_v41 = vpack.c.bf16 %v1340_v13, %v1338_v12  ;;  %736 = vmatprep.mubr.f32.mxu0 %v1254_v38  ;;  %v1425_v42 = vpack.c.bf16 %v1344_v15, %v1342_v14  ;;  %s98_s1 = sadd.s32 1, %s1258_s1   ;;  %s1258_s1 = sphi %s1392_s1, %s98_s1   ;;  %v1254_v38 = vphi %v1390_v38, %v1562_v38   ;;  %v1250_v37 = vphi %v1388_v37, %v1561_v37   ;;  %v1246_v36 = vphi %v1386_v36, %v1560_v36   ;;  %v1242_v35 = vphi %v1384_v35, %v1559_v35   ;;  %v1238_v34 = vphi %v1382_v34, %v1558_v34   ;;  %v1234_v33 = vphi %v1380_v33, %v1557_v33  }
  0xb9   : > { %v1432_v43 = vpack.c.bf16 %v1348_v17, %v1346_v16  ;;  %v1439_v44 = vpack.c.bf16 %v1352_v19, %v1350_v18  ;;  %v1446_v45 = vpack.c.bf16 %v1356_v21, %v1354_v20  ;;  %v1453_v46 = vpack.c.bf16 %v1360_v23, %v1358_v22  ;;  %p95_p2 = scmp.ge.s32.totalorder %s98_s1, 29  }
  0xba   : > { %869 = vmatprep.subr.bf16.mxu0 %v1405_v39  ;;  %901 = vmatprep.subr.bf16.mxu1 %v1405_v39  ;;  %s1267_s13 = smov (%p95_p2), [#allocation7]  }
  0xbb   : > { %871 = vmatpush3.bf16.msra.mxu0 %v1405_v39  ;;  %903 = vmatpush3.bf16.xpose.msra.mxu1 %v1405_v39  ;;  %s580_s14 = sshll.u32 (%p95_p2), %s1267_s13, 4  ;;  %s581_s14 = int_to_ptr.vmem [resolvable:$true] %s580_s14 }
  0xbc   : > { %873 = vmatprep.subr.bf16.mxu0 %v1409_v40  ;;  %905 = vmatprep.subr.bf16.mxu1 %v1409_v40  ;;  %s1176_s15 = scalar_lea.vmem (%p95_p2), %s581_s14, 256  ;;  %p1181_p4 = scmp.lt.s32.totalorder (%p95_p2), %s581_s14, %s581_s14 }
  0xbd   :  { %p1177_p3 = scmp.ne.s32.totalorder (%p95_p2), %s581_s14, %s1176_s15  ;;  %p1182_p5 = scmp.lt.s32.totalorder (%p95_p2), %s1176_s15, %s1176_s15 }
  0xbf   : > { %875 = vmatpush3.bf16.msra.mxu0 %v1409_v40  ;;  %p1183_p6 = por (%p95_p2), %p1182_p5, %p1181_p4 }
  0xc0   : > { %877 = vmatprep.subr.bf16.mxu0 %v1418_v41 }
  0xc1   :  { %p1184_p7 = pnand (%p95_p2), %p1183_p6, %p1177_p3 }
  0xc3   : > { %879 = vmatpush3.bf16.msra.mxu0 %v1418_v41  ;;  %907 = vmatpush3.bf16.xpose.msra.mxu1 %v1409_v40 }
  0xc4   : > { %881 = vmatprep.subr.bf16.mxu0 %v1425_v42  ;;  %909 = vmatprep.subr.bf16.mxu1 %v1418_v41 }
  0xc7   : > { %883 = vmatpush3.bf16.msra.mxu0 %v1425_v42 }
  0xc8   : > { %885 = vmatprep.subr.bf16.mxu0 %v1432_v43 }
  0xcb   : > { %887 = vmatpush3.bf16.msra.mxu0 %v1432_v43  ;;  %911 = vmatpush3.bf16.xpose.msra.mxu1 %v1418_v41 }
  0xcc   : > { %889 = vmatprep.subr.bf16.mxu0 %v1439_v44  ;;  %913 = vmatprep.subr.bf16.mxu1 %v1425_v42 }
  0xcf   : > { %891 = vmatpush3.bf16.msra.mxu0 %v1439_v44 }
  0xd0   : > { %893 = vmatprep.subr.bf16.mxu0 %v1446_v45 }
  0xd3   : > { %895 = vmatpush3.bf16.msra.mxu0 %v1446_v45  ;;  %915 = vmatpush3.bf16.xpose.msra.mxu1 %v1425_v42 }
  0xd4   : > { %897 = vmatprep.subr.bf16.mxu0 %v1453_v46  ;;  %917 = vmatprep.subr.bf16.mxu1 %v1432_v43 }
  0xd7   : > { %899 = vmatpush3.bf16.msra.mxu0 %v1453_v46 }
  0xd8   :  { %933 = vmatprep.subr.bf16.mxu0 (%p95_p2), %v1405_v39 }
  0xda   : > { %737 = vmatmul.mubr.f32.vlgmr.msra.gmra.mrb[0].mxu0 %v1250_v37 }
  0xdb   : > { %739 = vmatprep.mubr.f32.mxu0 %v1246_v36  ;;  %919 = vmatpush3.bf16.xpose.msra.mxu1 %v1432_v43 }
  0xdc   : > { %921 = vmatprep.subr.bf16.mxu1 %v1439_v44  ;;  %935 = vmatpush3.bf16.msra.mxu0 (%p95_p2), %v1405_v39 }
  0xdd   :  { %937 = vmatprep.subr.bf16.mxu0 (%p95_p2), %v1409_v40 }
  0xde   : > { %740 = vmatmul.mubr.f32.gmra.mrb[2].mxu0 %v1242_v35 }
  0xdf   : > { %742 = vmatprep.mubr.f32.mxu0 %v1238_v34 }
  0xe0   :  { %939 = vmatpush3.bf16.msra.mxu0 (%p95_p2), %v1409_v40 }
  0xe1   :  { %941 = vmatprep.subr.bf16.mxu0 (%p95_p2), %v1418_v41 }
  0xe2   : > { %743 = vmatmul.mubr.f32.gmra.mrb[4].mxu0 %v1234_v33 }
  0xe3   : > { %923 = vmatpush3.bf16.xpose.msra.mxu1 %v1439_v44 }
  0xe4   : > { %925 = vmatprep.subr.bf16.mxu1 %v1446_v45  ;;  %943 = vmatpush3.bf16.msra.mxu0 (%p95_p2), %v1418_v41 }
  0xe5   :  { %945 = vmatprep.subr.bf16.mxu0 (%p95_p2), %v1425_v42 }
  0xe8   :  { %947 = vmatpush3.bf16.msra.mxu0 (%p95_p2), %v1425_v42 }
  0xe9   :  { %949 = vmatprep.subr.bf16.mxu0 (%p95_p2), %v1432_v43 }
  0xeb   : > { %927 = vmatpush3.bf16.xpose.msra.mxu1 %v1446_v45 }
  0xec   : > { %929 = vmatprep.subr.bf16.mxu1 %v1453_v46  ;;  %951 = vmatpush3.bf16.msra.mxu0 (%p95_p2), %v1432_v43 }
  0xed   :  { %953 = vmatprep.subr.bf16.mxu0 (%p95_p2), %v1439_v44 }
  0xf0   :  { %955 = vmatpush3.bf16.msra.mxu0 (%p95_p2), %v1439_v44 }
  0xf1   :  { %957 = vmatprep.subr.bf16.mxu0 (%p95_p2), %v1446_v45 }
  0xf3   : > { %931 = vmatpush3.bf16.xpose.msra.mxu1 %v1453_v46 }
  0xf4   :  { %965 = vmatprep.subr.bf16.mxu1 (%p95_p2), %v1405_v39  ;;  %959 = vmatpush3.bf16.msra.mxu0 (%p95_p2), %v1446_v45 }
  0xf5   :  { %961 = vmatprep.subr.bf16.mxu0 (%p95_p2), %v1453_v46 }
  0xf8   :  { %963 = vmatpush3.bf16.msra.mxu0 (%p95_p2), %v1453_v46 }
 0x1ad   : > { %v738_v47 = vpop.f32.mrb[0].mxu0 }
 0x1ae   : > { %v177_v48 = vadd.f32 1e-30, %v738_v47  ;;  %v171_v49 = vpop.f32.mrb[1].mxu0 }
 0x1af   : > { %v172_v50 = vadd.f32 1e-30, %v171_v49 }
 0x1b0   : > { %1064 = vrcp.f32 %v177_v48 }
 0x1b1   : > { %1066 = vrcp.f32 %v172_v50  ;;  %v741_v51 = vpop.f32.mrb[2].mxu0 }
 0x1b2   : > { %v187_v52 = vadd.f32 1e-30, %v741_v51  ;;  %v181_v53 = vpop.f32.mrb[3].mxu0 }
 0x1b3   : > { %v182_v54 = vadd.f32 1e-30, %v181_v53 }
 0x1b4   : > { %1068 = vrcp.f32 %v187_v52 }
 0x1b5   : > { %1070 = vrcp.f32 %v182_v54  ;;  %v744_v55 = vpop.f32.mrb[4].mxu0 }
 0x1b6   : > { %v197_v56 = vadd.f32 1e-30, %v744_v55  ;;  %v191_v57 = vpop.f32.mrb[5].mxu0 }
 0x1b7   : > { %v192_v58 = vadd.f32 1e-30, %v191_v57 }
 0x1b8   : > { %1072 = vrcp.f32 %v197_v56 }
 0x1b9   : > { %1074 = vrcp.f32 %v192_v58 }
 0x1ba   : > { %v1065_v59 = vpop.eup %1064 }
 0x1bb   : > { %v1067_v60 = vpop.eup %1066  ;;  %v207_v62 = vmul.f32 %v1065_v59, %v1320_v3 }
 0x1bc   : > { %v206_v61 = vmul.f32 %v1067_v60, %v1318_v2 }
 0x1be   : > { %v1069_v63 = vpop.eup %1068  ;;  %777 = vmatprep.mubr.f32.mxu1 %v206_v61 }
 0x1bf   : > { %v1071_v0 = vpop.eup %1070  ;;  %778 = vmatmul.mubr.f32.vlgmr.msra.gmra.mrb[0].mxu1 %v207_v62  ;;  %v209_v24 = vmul.f32 %v1069_v63, %v1324_v5 }
 0x1c0   : > { %v208_v1 = vmul.f32 %v1071_v0, %v1322_v4  ;;  %967 = vmatpush3.bf16.xpose.msra.mxu1 (%p95_p2), %v1405_v39 }
 0x1c1   :  { %969 = vmatprep.subr.bf16.mxu1 (%p95_p2), %v1409_v40 }
 0x1c2   : > { %v1073_v25 = vpop.eup %1072  ;;  %780 = vmatprep.mubr.f32.mxu1 %v208_v1 }
 0x1c3   : > { %v1075_v26 = vpop.eup %1074  ;;  %781 = vmatmul.mubr.f32.gmra.mrb[2].mxu1 %v209_v24  ;;  %v211_v34 = vmul.f32 %v1073_v25, %v1328_v7 }
 0x1c4   : > { %v210_v33 = vmul.f32 %v1075_v26, %v1326_v6 }
 0x1c6   : > { %783 = vmatprep.mubr.f32.mxu1 %v210_v33 }
 0x1c7   : > { %784 = vmatmul.mubr.f32.gmra.mrb[4].mxu1 %v211_v34 }
 0x1c8   :  { %971 = vmatpush3.bf16.xpose.msra.mxu1 (%p95_p2), %v1409_v40 }
 0x1c9   :  { %973 = vmatprep.subr.bf16.mxu1 (%p95_p2), %v1418_v41 }
 0x1d0   :  { %975 = vmatpush3.bf16.xpose.msra.mxu1 (%p95_p2), %v1418_v41 }
 0x1d1   :  { %977 = vmatprep.subr.bf16.mxu1 (%p95_p2), %v1425_v42 }
 0x1d8   :  { %979 = vmatpush3.bf16.xpose.msra.mxu1 (%p95_p2), %v1425_v42 }
 0x1d9   :  { %981 = vmatprep.subr.bf16.mxu1 (%p95_p2), %v1432_v43 }
 0x1e0   :  { %983 = vmatpush3.bf16.xpose.msra.mxu1 (%p95_p2), %v1432_v43 }
 0x1e1   :  { %985 = vmatprep.subr.bf16.mxu1 (%p95_p2), %v1439_v44 }
 0x1e8   :  { %987 = vmatpush3.bf16.xpose.msra.mxu1 (%p95_p2), %v1439_v44 }
 0x1e9   :  { %989 = vmatprep.subr.bf16.mxu1 (%p95_p2), %v1446_v45 }
 0x1f0   :  { %991 = vmatpush3.bf16.xpose.msra.mxu1 (%p95_p2), %v1446_v45 }
 0x1f1   :  { %993 = vmatprep.subr.bf16.mxu1 (%p95_p2), %v1453_v46 }
 0x1f8   :  { %995 = vmatpush3.bf16.xpose.msra.mxu1 (%p95_p2), %v1453_v46 }
 0x292   : > { %v779_v35 = vpop.f32.mrb[0].mxu1 }
 0x293   : > { %v284_v36 = vadd.f32 1e-30, %v779_v35  ;;  %v278_v37 = vpop.f32.mrb[1].mxu1 }
 0x294   : > { %v279_v38 = vadd.f32 1e-30, %v278_v37 }
 0x295   : > { %1076 = vlog2.f32 %v284_v36 }
 0x296   : > { %v782_v47 = vpop.f32.mrb[2].mxu1  ;;  %1078 = vlog2.f32 %v279_v38 }
 0x297   : > { %v294_v48 = vadd.f32 1e-30, %v782_v47  ;;  %v288_v49 = vpop.f32.mrb[3].mxu1 }
 0x298   : > { %v289_v50 = vadd.f32 1e-30, %v288_v49 }
 0x299   : > { %1080 = vlog2.f32 %v294_v48 }
 0x29a   : > { %v785_v51 = vpop.f32.mrb[4].mxu1  ;;  %1082 = vlog2.f32 %v289_v50 }
 0x29b   : > { %v304_v52 = vadd.f32 1e-30, %v785_v51  ;;  %v298_v53 = vpop.f32.mrb[5].mxu1 }
 0x29c   : > { %v299_v54 = vadd.f32 1e-30, %v298_v53 }
 0x29d   : > { %1084 = vlog2.f32 %v304_v52 }
 0x29e   : > { %1086 = vlog2.f32 %v299_v54 }
 0x29f   : > { %v1077_v55 = vpop.eup %1076  ;;  %1088 = vrcp.f32 %v284_v36 }
 0x2a0   : > { %v1079_v56 = vpop.eup %1078  ;;  %v310_v57 = vmul.f32 0.6931472, %v1077_v55  ;;  %1090 = vrcp.f32 %v279_v38 }
 0x2a1   : > { %v308_v59 = vmul.f32 0.6931472, %v1079_v56  ;;  %1092 = vrcp.f32 %v294_v48 }
 0x2a2   : > { %v320_v62 = vmul.f32 %v310_v57, %v1374_v30  ;;  %1094 = vrcp.f32 %v289_v50 }
 0x2a3   : > { %v1081_v58 = vpop.eup %1080  ;;  %v319_v24 = vmul.f32 %v308_v59, %v1370_v28  ;;  %1096 = vrcp.f32 %v304_v52 }
 0x2a4   : > { %v314_v60 = vmul.f32 0.6931472, %v1081_v58  ;;  %v1083_v61 = vpop.eup %1082 }
 0x2a5   : > { %v312_v0 = vmul.f32 0.6931472, %v1083_v61 }
 0x2a6   : > { %v322_v63 = vmul.f32 %v314_v60, %v1372_v29 }
 0x2a7   : > { %v1085_v1 = vpop.eup %1084  ;;  %v321_v26 = vmul.f32 %v312_v0, %v1368_v27 }
 0x2a8   : > { %v324_v25 = vadd.f32 %v322_v63, %v320_v62  ;;  %v318_v33 = vmul.f32 0.6931472, %v1085_v1  ;;  %v1087_v34 = vpop.eup %1086 }
 0x2a9   : > { %v323_v35 = vadd.f32 %v321_v26, %v319_v24  ;;  %v316_v47 = vmul.f32 0.6931472, %v1087_v34  ;;  %v1089_v57 = vpop.eup %1088 }
 0x2aa   : > { %v326_v37 = vmul.f32 %v318_v33, %v1376_v31  ;;  %v1091_v58 = vpop.eup %1090 }
 0x2ab   : > { %v325_v51 = vmul.f32 %v316_v47, %v1378_v32  ;;  %v1093_v59 = vpop.eup %1092 }
 0x2ac   : > { %v328_v49 = vadd.f32 %v326_v37, %v324_v25  ;;  %v1095_v60 = vpop.eup %1094 }
 0x2ad   : > { %v327_v55 = vadd.f32 %v325_v51, %v323_v35  ;;  %v1097_v61 = vpop.eup %1096 }
 0x2ae   : > { %v331_v53 = vmul.f32 1.442695, %v328_v49 }
 0x2af   : > { %v329_v56 = vmul.f32 1.442695, %v327_v55 }
 0x2b0   : > { %1098 = vpow2.f32 %v331_v53 }
 0x2b1   : > { %1100 = vrcp.f32 %v299_v54 }
 0x2b2   : > { %1102 = vpow2.f32 %v329_v56 }
 0x2b9   :  { %97 = sbr.rel (!%p95_p2) target bundleno = 184 (0xb8), region = 47 }
 0x2ba   : > { %v1099_v62 = vpop.eup %1098 }
 0x2bb   : > { %v1101_v36 = vpop.eup %1100  ;;  %v340_v63 = vmul.f32 %v1099_v62, %v1089_v57   ;;  %v342_v0 = vmul.f32 %v1099_v62, %v1093_v59   ;;  %v344_v1 = vmul.f32 %v1099_v62, %v1097_v61  }
 0x2bc   : > { %v1103_v38 = vpop.eup %1102 }
 0x2bd   : > { %v339_v48 = vmul.f32 %v1103_v38, %v1091_v58   ;;  %v341_v50 = vmul.f32 %v1103_v38, %v1095_v60   ;;  %v343_v24 = vmul.f32 %v1103_v38, %v1101_v36   ;;  %v1557_v33 = vmov %v344_v1 }
 0x2be   : > { %v1559_v35 = vmov %v342_v0  ;;  %v1561_v37 = vmov %v340_v63 }
 0x2bf   : > { %v1558_v34 = vmov %v343_v24  ;;  %v1560_v36 = vmov %v341_v50  ;;  %v1562_v38 = vmov %v339_v48  ;;  %818 = vmatprep.mubr.f32.mxu0 (%p95_p2), %v339_v48 }
 0x2c0   :  { %819 = vmatmul.mubr.f32.vlgmr.msra.gmra.mrb[0].mxu0 %v340_v63 }
 0x2c1   :  { %821 = vmatprep.mubr.f32.mxu0 %v341_v50 }
 0x2c4   :  { %822 = vmatmul.mubr.f32.gmra.mrb[2].mxu0 %v342_v0 }
 0x2c5   :  { %824 = vmatprep.mubr.f32.mxu0 %v343_v24 }
 0x2c8   :  { %825 = vmatmul.mubr.f32.gmra.mrb[4].mxu0 %v344_v1 }
 0x393   :  { %v820_v8 = vpop.f32.mrb[0].mxu0 }
 0x394   :  { %v417_v9 = vadd.f32 1e-30, %v820_v8  ;;  %v411_v10 = vpop.f32.mrb[1].mxu0 }
 0x395   :  { %v412_v11 = vadd.f32 1e-30, %v411_v10 }
 0x396   :  { %1104 = vrcp.f32 %v417_v9 }
 0x397   :  { %1106 = vrcp.f32 %v412_v11  ;;  %v823_v12 = vpop.f32.mrb[2].mxu0 }
 0x398   :  { %v427_v13 = vadd.f32 1e-30, %v823_v12  ;;  %v421_v14 = vpop.f32.mrb[3].mxu0 }
 0x399   :  { %v422_v15 = vadd.f32 1e-30, %v421_v14 }
 0x39a   :  { %1108 = vrcp.f32 %v427_v13 }
 0x39b   :  { %1110 = vrcp.f32 %v422_v15  ;;  %v826_v16 = vpop.f32.mrb[4].mxu0 }
 0x39c   :  { %v437_v17 = vadd.f32 1e-30, %v826_v16  ;;  %v431_v18 = vpop.f32.mrb[5].mxu0 }
 0x39d   :  { %v432_v19 = vadd.f32 1e-30, %v431_v18 }
 0x39e   :  { %1112 = vrcp.f32 %v437_v17 }
 0x39f   :  { %1114 = vrcp.f32 %v432_v19 }
 0x3a0   :  { %v1105_v20 = vpop.eup %1104 }
 0x3a1   :  { %v1107_v21 = vpop.eup %1106  ;;  %v447_v23 = vmul.f32 %v1105_v20, %v1320_v3 }
 0x3a2   :  { %v446_v22 = vmul.f32 %v1107_v21, %v1318_v2 }
 0x3a4   :  { %v1109_v39 = vpop.eup %1108  ;;  %859 = vmatprep.mubr.f32.mxu1 %v446_v22 }
 0x3a5   :  { %v1111_v40 = vpop.eup %1110  ;;  %860 = vmatmul.mubr.f32.vlgmr.msra.gmra.mrb[0].mxu1 %v447_v23  ;;  %v449_v42 = vmul.f32 %v1109_v39, %v1324_v5 }
 0x3a6   :  { %v448_v41 = vmul.f32 %v1111_v40, %v1322_v4 }
 0x3a8   :  { %v1113_v43 = vpop.eup %1112  ;;  %862 = vmatprep.mubr.f32.mxu1 %v448_v41 }
 0x3a9   :  { %v1115_v44 = vpop.eup %1114  ;;  %863 = vmatmul.mubr.f32.gmra.mrb[2].mxu1 %v449_v42  ;;  %v451_v46 = vmul.f32 %v1113_v43, %v1328_v7 }
 0x3aa   :  { %v450_v45 = vmul.f32 %v1115_v44, %v1326_v6 }
 0x3ac   :  { %865 = vmatprep.mubr.f32.mxu1 %v450_v45 }
 0x3ad   :  { %866 = vmatmul.mubr.f32.gmra.mrb[4].mxu1 %v451_v46 }
 0x478   :  { %v861_v2 = vpop.f32.mrb[0].mxu1 }
 0x479   :  { %v524_v3 = vadd.f32 1e-30, %v861_v2  ;;  %v518_v52 = vpop.f32.mrb[1].mxu1 }
 0x47a   :  { %v519_v54 = vadd.f32 1e-30, %v518_v52 }
 0x47b   :  { %1116 = vlog2.f32 %v524_v3 }
 0x47c   :  { %1118 = vlog2.f32 %v519_v54  ;;  %v864_v25 = vpop.f32.mrb[2].mxu1 }
 0x47d   :  { %v534_v4 = vadd.f32 1e-30, %v864_v25  ;;  %v528_v26 = vpop.f32.mrb[3].mxu1 }
 0x47e   :  { %v529_v5 = vadd.f32 1e-30, %v528_v26 }
 0x47f   :  { %1120 = vlog2.f32 %v534_v4 }
 0x480   :  { %1122 = vlog2.f32 %v529_v5  ;;  %v867_v33 = vpop.f32.mrb[4].mxu1 }
 0x481   :  { %v544_v34 = vadd.f32 1e-30, %v867_v33  ;;  %v538_v35 = vpop.f32.mrb[5].mxu1 }
 0x482   :  { %v539_v6 = vadd.f32 1e-30, %v538_v35 }
 0x483   :  { %1124 = vlog2.f32 %v544_v34 }
 0x484   :  { %1126 = vlog2.f32 %v539_v6 }
 0x485   :  { %v1117_v7 = vpop.eup %1116 }
 0x486   :  { %v1119_v37 = vpop.eup %1118  ;;  %v550_v47 = vmul.f32 0.6931472, %v1117_v7 }
 0x487   :  { %v548_v51 = vmul.f32 0.6931472, %v1119_v37 }
 0x488   :  { %v560_v57 = vmul.f32 %v550_v47, %v1374_v30 }
 0x489   :  { %v1121_v49 = vpop.eup %1120  ;;  %v559_v60 = vmul.f32 %v548_v51, %v1370_v28 }
 0x48a   :  { %v1123_v53 = vpop.eup %1122  ;;  %v554_v55 = vmul.f32 0.6931472, %v1121_v49 }
 0x48b   :  { %v552_v56 = vmul.f32 0.6931472, %v1123_v53 }
 0x48c   :  { %v562_v58 = vmul.f32 %v554_v55, %v1372_v29 }
 0x48d   :  { %v1125_v59 = vpop.eup %1124  ;;  %v561_v61 = vmul.f32 %v552_v56, %v1368_v27 }
 0x48e   :  { %v1127_v62 = vpop.eup %1126  ;;  %v564_v36 = vadd.f32 %v562_v58, %v560_v57  ;;  %v558_v63 = vmul.f32 0.6931472, %v1125_v59 }
 0x48f   :  { %v563_v0 = vadd.f32 %v561_v61, %v559_v60  ;;  %v556_v1 = vmul.f32 0.6931472, %v1127_v62 }
 0x490   :  { %v566_v38 = vmul.f32 %v558_v63, %v1376_v31 }
 0x491   :  { %v565_v48 = vmul.f32 %v556_v1, %v1378_v32 }
 0x492   :  { %v568_v50 = vadd.f32 %v566_v38, %v564_v36 }
 0x493   :  { %v567_v24 = vadd.f32 %v565_v48, %v563_v0 }
 0x494   :  { %v571_v8 = vmul.f32 1.442695, %v568_v50 }
 0x495   :  { %v569_v30 = vmul.f32 1.442695, %v567_v24 }
 0x496   :  { %1128 = vpow2.f32 %v571_v8 }
 0x497   :  { %1130 = vpow2.f32 %v569_v30 }
 0x4a0   :  { %v1129_v28 = vpop.eup %1128 }
 0x4a1   :  { %v1131_v27 = vpop.eup %1130  ;;  %574 = vst [vmem:[#allocation7 + $0x8] sm:$0xff] %v1129_v28 }
 0x4a2   :  { %573 = vst [vmem:[#allocation7] sm:$0xff] %v1131_v27 }
 0x4a3   :  { %1187 = shalt.err (!%p1184_p7)
}
 0x4a4   :  { %s1188_s18 = scalar_lea.hbm %s1556_s3, 256 }
 0x4a5   :  { %p1189_p8 = scmp.ne.s32.totalorder %s1556_s3, %s1188_s18  ;;  %p1192_p9 = scmp.lt.u32.totalorder %s1188_s18, %s1556_s3 }
 0x4a7   :  { %p1194_p10 = pnand %p1192_p9, %p1189_p8 }
 0x4a9   :  { %1197 = shalt.err (!%p1194_p10)
}
 0x4aa   :  { %586 = dma.vmem_to_hbm [thread:$0]  %s581_s14, 256, %s1556_s3, [#allocation4], %s1261_s22, %s1261_s22, %s1262_s23  }
 0x4ab   :  { %1230 = dma.done.wait [#allocation4], 256  }
 0x4ac   :  { %1231 = vsyncadd [#allocation4], 4294967040 }
 0x4ad   :  { %590 = vsyncpa [#allocation3], 1 }
 0x4ae   :  { %591 = vsyncpa [#allocation6], 1 }
 0x4af   :  { %592 = vsyncpa [#allocation4], 1 }

</bundles_post_ra>
